<compile_context>
chip_gen: v7x
topology: tpu7x:2x2x1
jax: 0.10.0
libtpu: 0.0.40
codegen_flags: <defaults>
</compile_context>

<pallas_src>
import functools
import math

import jax
import jax.numpy as jnp
from jax.experimental import pallas as pl
from jax.experimental.pallas import tpu as pltpu

_LANE = 128  # f32 lane width
_SUB = 8     # f32 sublane width


def _rup(n, m):
    return ((n + m - 1) // m) * m


# ----------------------------------------------------------------------------
# Kernel
# ----------------------------------------------------------------------------
def _san_kernel(x_ref, noise_ref, slab_ref, out_ref, *, w_offs, w_rows, b_off, np_lanes):
    """One fused forward pass over the current batch tile.

    slab_ref rows: [W1 | W2 | ... | W9 | bias block], all padded to np_lanes lanes.
    Layer order: enc1..enc4, fused(mean|log_std), dec1(dup rows), dec2, dec3, dec4.
    """

    def linear(h, layer, act):
        off, rows = w_offs[layer], w_rows[layer]
        w = slab_ref[off:off + rows, :]                          # static slice
        b = slab_ref[b_off + layer:b_off + layer + 1, :]         # (1, np_lanes)
        y = jnp.dot(h, w, preferred_element_type=jnp.float32) + b
        return jnp.tanh(y) if act else y

    h = x_ref[...]                                               # [TB, KIN]
    # encoder: input_n -> 24 -> 12 -> 6 -> 3 (tanh after each)
    h = linear(h, 0, act=True)
    h = linear(h, 1, act=True)
    h = linear(h, 2, act=True)
    h = linear(h, 3, act=True)

    # fused heads: lanes 0:3 = mean, lanes 3:6 = log_std (one MXU pass)
    head = linear(h, 4, act=False)
    lane = jax.lax.broadcasted_iota(jnp.int32, (1, np_lanes), 1)
    m_mask = (lane < 3).astype(jnp.float32)
    # z_split lanes: [m0 m1 m2 | exp(s0..2)*eps0..2 | 0 ...]; the duplicated
    # rows of the first decoder weight sum these inside the next matmul, i.e.
    # z_split @ dup(Wd1) == (m + exp(s)*eps) @ Wd1.
    z = head * m_mask + jnp.exp(head) * noise_ref[...]

    # decoder: 3 -> 6 -> 12 -> 24 -> output_n (no activation on the last layer)
    d = linear(z, 5, act=True)
    d = linear(d, 6, act=True)
    d = linear(d, 7, act=True)
    out_ref[...] = linear(d, 8, act=False)                       # lane-dense store


# ----------------------------------------------------------------------------
# Parameter init (PyTorch nn.Linear default) and slab packing
# ----------------------------------------------------------------------------
def _init_linear(key, fan_in, fan_out):
    """U(-1/sqrt(fan_in), 1/sqrt(fan_in)); weight stored transposed (in, out)."""
    kw, kb = jax.random.split(key)
    bound = 1.0 / math.sqrt(fan_in)
    w = jax.random.uniform(kw, (fan_in, fan_out), jnp.float32, -bound, bound)
    b = jax.random.uniform(kb, (1, fan_out), jnp.float32, -bound, bound)
    return w, b


def init_san_params(key, input_n, output_n):
    dims = [
        (input_n, 24), (24, 12), (12, 6), (6, 3),      # encoder
        (3, 3), (3, 3),                                # mean, log_std
        (3, 6), (6, 12), (12, 24), (24, output_n),     # decoder
    ]
    keys = jax.random.split(key, len(dims))
    params = []
    for k, (fi, fo) in zip(keys, dims):
        params.extend(_init_linear(k, fi, fo))
    return params  # flat: [w, b, w, b, ...]


def pack_san_params(params, input_n, output_n):
    """Pack all weights/biases into one lane-dense f32 slab + static offsets."""
    (we1, be1, we2, be2, we3, be3, we4, be4,
     wm, bm, ws, bs,
     wd1, bd1, wd2, bd2, wd3, bd3, wd4, bd4) = params

    np_lanes = _rup(max(24, output_n), _LANE)   # common padded lane width
    kin = _rup(input_n, _LANE)                  # padded input feature width

    # fused mean/log_std head: cols 0:3 = mean, cols 3:6 = log_std
    w_head = jnp.concatenate([wm, ws], axis=1)                              # (3, 6)
    b_head = jnp.concatenate([bm.reshape(-1), bs.reshape(-1)])              # (6,)
    # decoder-1 with duplicated rows: rows 0:3 act on m, rows 3:6 on exp(s)*eps
    w_d1 = jnp.concatenate([wd1, wd1], axis=0)                              # (6, 6)

    weights = [
        (we1, kin), (we2, np_lanes), (we3, np_lanes), (we4, np_lanes),
        (w_head, np_lanes), (w_d1, np_lanes),
        (wd2, np_lanes), (wd3, np_lanes), (wd4, np_lanes),
    ]
    biases = [be1, be2, be3, be4, b_head, bd1, bd2, bd3, bd4]

    blocks, offs, r = [], [], 0
    for w, rows in weights:
        blk = jnp.zeros((rows, np_lanes), jnp.float32)
        blk = blk.at[: w.shape[0], : w.shape[1]].set(w.astype(jnp.float32))
        blocks.append(blk)
        offs.append(r)
        r += rows

    bias_rows = _rup(len(biases), _SUB)
    bias_blk = jnp.zeros((bias_rows, np_lanes), jnp.float32)
    for i, b in enumerate(biases):
        b = jnp.asarray(b, jnp.float32).reshape(-1)
        bias_blk = bias_blk.at[i, : b.shape[0]].set(b)
    blocks.append(bias_blk)

    slab = jnp.concatenate(blocks, axis=0)
    meta = dict(np_lanes=np_lanes, kin=kin,
                w_offs=tuple(offs), w_rows=tuple(rows for _, rows in weights),
                b_off=r)
    return slab, meta


# ----------------------------------------------------------------------------
# Forward wrapper
# ----------------------------------------------------------------------------
def san_controller_forward(x, noise, slab, meta, output_n, *, batch_tile=512):
    """x: [B, input_n] f32, noise: [B, 3] f32 ~ N(0,1). Returns [B, output_n]."""
    B, input_n = x.shape
    np_lanes, kin = meta["np_lanes"], meta["kin"]

    kernel = functools.partial(
        _san_kernel, w_offs=meta["w_offs"], w_rows=meta["w_rows"],
        b_off=meta["b_off"], np_lanes=np_lanes)

    small = B <= batch_tile
    b_pad = _rup(B, _SUB) if small else _rup(B, batch_tile)

    # Lane-dense, zero-padded inputs; noise goes to lanes 3:6 to align with the
    # log_std lanes of the fused head output.
    x_pad = jnp.zeros((b_pad, kin), jnp.float32).at[:B, :input_n].set(x)
    noise_pad = jnp.zeros((b_pad, np_lanes), jnp.float32).at[:B, 3:6].set(noise)

    if small:
        # Single invocation, no grid, whole arrays resident in VMEM.
        out_pad = pl.pallas_call(
            kernel,
            out_shape=jax.ShapeDtypeStruct((b_pad, np_lanes), jnp.float32),
            in_specs=[pl.BlockSpec(memory_space=pltpu.MemorySpace.VMEM)] * 3,
            out_specs=pl.BlockSpec(memory_space=pltpu.MemorySpace.VMEM),
        )(x_pad, noise_pad, slab)
    else:
        # Row-tiled parallel grid: overlaps x/out DMA with compute and shards
        # across TensorCores; the weight slab stays resident (constant index_map).
        tb = batch_tile
        out_pad = pl.pallas_call(
            kernel,
            out_shape=jax.ShapeDtypeStruct((b_pad, np_lanes), jnp.float32),
            grid=(b_pad // tb,),
            in_specs=[
                pl.BlockSpec((tb, kin), lambda i: (i, 0)),
                pl.BlockSpec((tb, np_lanes), lambda i: (i, 0)),
                pl.BlockSpec(slab.shape, lambda i: (0, 0)),
            ],
            out_specs=pl.BlockSpec((tb, np_lanes), lambda i: (i, 0)),
            compiler_params=pltpu.CompilerParams(
                dimension_semantics=("parallel",)),
        )(x_pad, noise_pad, slab)

    return out_pad[:B, :output_n]


# ----------------------------------------------------------------------------
# Pure-JAX reference (mirrors the PyTorch module exactly)
# ----------------------------------------------------------------------------
def san_controller_reference(x, noise, params):
    (we1, be1, we2, be2, we3, be3, we4, be4,
     wm, bm, ws, bs,
     wd1, bd1, wd2, bd2, wd3, bd3, wd4, bd4) = params
    h = x
    for w, b in ((we1, be1), (we2, be2), (we3, be3), (we4, be4)):
        h = jnp.tanh(h @ w + b)
    m = h @ wm + bm
    s = h @ ws + bs
    z = m + jnp.exp(s) * noise
    d = z
    for w, b in ((wd1, bd1), (wd2, bd2), (wd3, bd3)):
        d = jnp.tanh(d @ w + b)
    return d @ wd4 + bd4


if __name__ == "__main__":
    input_n, output_n, batch = 32, 32, 8

    key = jax.random.PRNGKey(0)
    k_params, k_x, k_noise = jax.random.split(key, 3)

    params = init_san_params(k_params, input_n, output_n)
    slab, meta = pack_san_params(params, input_n, output_n)

    x = jax.random.normal(k_x, (batch, input_n), dtype=jnp.float32)
    # torch.randn_like(s): s has shape [batch, 3]; drawn host-side for parity.
    noise = jax.random.normal(k_noise, (batch, 3), dtype=jnp.float32)

    out = san_controller_forward(x, noise, slab, meta, output_n)
    out = jax.block_until_ready(out)

    ref = san_controller_reference(x, noise, params)
    assert out.shape == (batch, output_n)
    assert jnp.allclose(out, ref, atol=1e-5, rtol=1e-5), "mismatch vs reference"

    print("KERNEL_OK")
</pallas_src>

<mosaic_0001>
module attributes {stable_mosaic.version = 11 : i64} {
  func.func @_san_kernel(%arg0: memref<8x128xf32, #tpu.memory_space<vmem>>, %arg1: memref<8x128xf32, #tpu.memory_space<vmem>>, %arg2: memref<1168x128xf32, #tpu.memory_space<vmem>>, %arg3: memref<8x128xf32, #tpu.memory_space<vmem>>) attributes {dimension_semantics = [], scalar_prefetch = 0 : i64, scratch_operands = 0 : i64, tpu.core_type = #tpu.core_type<tc>} {
    %c0 = arith.constant 0 : index
    %c0_0 = arith.constant 0 : index
    %0 = vector.load %arg0[%c0, %c0_0] : memref<8x128xf32, #tpu.memory_space<vmem>>, vector<8x128xf32>
    %c0_1 = arith.constant 0 : index
    %c0_2 = arith.constant 0 : index
    %1 = vector.load %arg2[%c0_1, %c0_2] : memref<1168x128xf32, #tpu.memory_space<vmem>>, vector<128x128xf32>
    %c1152 = arith.constant 1152 : index
    %c0_3 = arith.constant 0 : index
    %2 = vector.load %arg2[%c1152, %c0_3] : memref<1168x128xf32, #tpu.memory_space<vmem>>, vector<1x128xf32>
    %cst = arith.constant dense<0.000000e+00> : vector<8x128xf32>
    %3 = tpu.matmul %0, %1, %cst {dimension_numbers = #tpu.dot_dimension_numbers<[1], [0], [0], [1], [0, 0, 1, 1], [], []>} : vector<8x128xf32>, vector<128x128xf32>, vector<8x128xf32> -> vector<8x128xf32>
    %4 = vector.broadcast %2 : vector<1x128xf32> to vector<8x128xf32>
    %5 = arith.addf %3, %4 : vector<8x128xf32>
    %6 = math.tanh %5 : vector<8x128xf32>
    %c128 = arith.constant 128 : index
    %c0_4 = arith.constant 0 : index
    %7 = vector.load %arg2[%c128, %c0_4] : memref<1168x128xf32, #tpu.memory_space<vmem>>, vector<128x128xf32>
    %c1153 = arith.constant 1153 : index
    %c0_5 = arith.constant 0 : index
    %8 = vector.load %arg2[%c1153, %c0_5] : memref<1168x128xf32, #tpu.memory_space<vmem>>, vector<1x128xf32>
    %cst_6 = arith.constant dense<0.000000e+00> : vector<8x128xf32>
    %9 = tpu.matmul %6, %7, %cst_6 {dimension_numbers = #tpu.dot_dimension_numbers<[1], [0], [0], [1], [0, 0, 1, 1], [], []>} : vector<8x128xf32>, vector<128x128xf32>, vector<8x128xf32> -> vector<8x128xf32>
    %10 = vector.broadcast %8 : vector<1x128xf32> to vector<8x128xf32>
    %11 = arith.addf %9, %10 : vector<8x128xf32>
    %12 = math.tanh %11 : vector<8x128xf32>
    %c256 = arith.constant 256 : index
    %c0_7 = arith.constant 0 : index
    %13 = vector.load %arg2[%c256, %c0_7] : memref<1168x128xf32, #tpu.memory_space<vmem>>, vector<128x128xf32>
    %c1154 = arith.constant 1154 : index
    %c0_8 = arith.constant 0 : index
    %14 = vector.load %arg2[%c1154, %c0_8] : memref<1168x128xf32, #tpu.memory_space<vmem>>, vector<1x128xf32>
    %cst_9 = arith.constant dense<0.000000e+00> : vector<8x128xf32>
    %15 = tpu.matmul %12, %13, %cst_9 {dimension_numbers = #tpu.dot_dimension_numbers<[1], [0], [0], [1], [0, 0, 1, 1], [], []>} : vector<8x128xf32>, vector<128x128xf32>, vector<8x128xf32> -> vector<8x128xf32>
    %16 = vector.broadcast %14 : vector<1x128xf32> to vector<8x128xf32>
    %17 = arith.addf %15, %16 : vector<8x128xf32>
    %18 = math.tanh %17 : vector<8x128xf32>
    %c384 = arith.constant 384 : index
    %c0_10 = arith.constant 0 : index
    %19 = vector.load %arg2[%c384, %c0_10] : memref<1168x128xf32, #tpu.memory_space<vmem>>, vector<128x128xf32>
    %c1155 = arith.constant 1155 : index
    %c0_11 = arith.constant 0 : index
    %20 = vector.load %arg2[%c1155, %c0_11] : memref<1168x128xf32, #tpu.memory_space<vmem>>, vector<1x128xf32>
    %cst_12 = arith.constant dense<0.000000e+00> : vector<8x128xf32>
    %21 = tpu.matmul %18, %19, %cst_12 {dimension_numbers = #tpu.dot_dimension_numbers<[1], [0], [0], [1], [0, 0, 1, 1], [], []>} : vector<8x128xf32>, vector<128x128xf32>, vector<8x128xf32> -> vector<8x128xf32>
    %22 = vector.broadcast %20 : vector<1x128xf32> to vector<8x128xf32>
    %23 = arith.addf %21, %22 : vector<8x128xf32>
    %24 = math.tanh %23 : vector<8x128xf32>
    %c512 = arith.constant 512 : index
    %c0_13 = arith.constant 0 : index
    %25 = vector.load %arg2[%c512, %c0_13] : memref<1168x128xf32, #tpu.memory_space<vmem>>, vector<128x128xf32>
    %c1156 = arith.constant 1156 : index
    %c0_14 = arith.constant 0 : index
    %26 = vector.load %arg2[%c1156, %c0_14] : memref<1168x128xf32, #tpu.memory_space<vmem>>, vector<1x128xf32>
    %cst_15 = arith.constant dense<0.000000e+00> : vector<8x128xf32>
    %27 = tpu.matmul %24, %25, %cst_15 {dimension_numbers = #tpu.dot_dimension_numbers<[1], [0], [0], [1], [0, 0, 1, 1], [], []>} : vector<8x128xf32>, vector<128x128xf32>, vector<8x128xf32> -> vector<8x128xf32>
    %28 = vector.broadcast %26 : vector<1x128xf32> to vector<8x128xf32>
    %29 = arith.addf %27, %28 : vector<8x128xf32>
    %30 = tpu.iota {dimensions = array<i32: 1>} : vector<1x128xi32>
    %c3_i32 = arith.constant 3 : i32
    %31 = vector.broadcast %c3_i32 : i32 to vector<1x128xi32>
    %32 = arith.cmpi slt, %30, %31 : vector<1x128xi32>
    %33 = arith.extui %32 : vector<1x128xi1> to vector<1x128xi32>
    %34 = arith.sitofp %33 : vector<1x128xi32> to vector<1x128xf32>
    %35 = vector.broadcast %34 : vector<1x128xf32> to vector<8x128xf32>
    %36 = arith.mulf %29, %35 : vector<8x128xf32>
    %37 = math.exp %29 : vector<8x128xf32>
    %c0_16 = arith.constant 0 : index
    %c0_17 = arith.constant 0 : index
    %38 = vector.load %arg1[%c0_16, %c0_17] : memref<8x128xf32, #tpu.memory_space<vmem>>, vector<8x128xf32>
    %39 = arith.mulf %37, %38 : vector<8x128xf32>
    %40 = arith.addf %36, %39 : vector<8x128xf32>
    %c640 = arith.constant 640 : index
    %c0_18 = arith.constant 0 : index
    %41 = vector.load %arg2[%c640, %c0_18] : memref<1168x128xf32, #tpu.memory_space<vmem>>, vector<128x128xf32>
    %c1157 = arith.constant 1157 : index
    %c0_19 = arith.constant 0 : index
    %42 = vector.load %arg2[%c1157, %c0_19] : memref<1168x128xf32, #tpu.memory_space<vmem>>, vector<1x128xf32>
    %cst_20 = arith.constant dense<0.000000e+00> : vector<8x128xf32>
    %43 = tpu.matmul %40, %41, %cst_20 {dimension_numbers = #tpu.dot_dimension_numbers<[1], [0], [0], [1], [0, 0, 1, 1], [], []>} : vector<8x128xf32>, vector<128x128xf32>, vector<8x128xf32> -> vector<8x128xf32>
    %44 = vector.broadcast %42 : vector<1x128xf32> to vector<8x128xf32>
    %45 = arith.addf %43, %44 : vector<8x128xf32>
    %46 = math.tanh %45 : vector<8x128xf32>
    %c768 = arith.constant 768 : index
    %c0_21 = arith.constant 0 : index
    %47 = vector.load %arg2[%c768, %c0_21] : memref<1168x128xf32, #tpu.memory_space<vmem>>, vector<128x128xf32>
    %c1158 = arith.constant 1158 : index
    %c0_22 = arith.constant 0 : index
    %48 = vector.load %arg2[%c1158, %c0_22] : memref<1168x128xf32, #tpu.memory_space<vmem>>, vector<1x128xf32>
    %cst_23 = arith.constant dense<0.000000e+00> : vector<8x128xf32>
    %49 = tpu.matmul %46, %47, %cst_23 {dimension_numbers = #tpu.dot_dimension_numbers<[1], [0], [0], [1], [0, 0, 1, 1], [], []>} : vector<8x128xf32>, vector<128x128xf32>, vector<8x128xf32> -> vector<8x128xf32>
    %50 = vector.broadcast %48 : vector<1x128xf32> to vector<8x128xf32>
    %51 = arith.addf %49, %50 : vector<8x128xf32>
    %52 = math.tanh %51 : vector<8x128xf32>
    %c896 = arith.constant 896 : index
    %c0_24 = arith.constant 0 : index
    %53 = vector.load %arg2[%c896, %c0_24] : memref<1168x128xf32, #tpu.memory_space<vmem>>, vector<128x128xf32>
    %c1159 = arith.constant 1159 : index
    %c0_25 = arith.constant 0 : index
    %54 = vector.load %arg2[%c1159, %c0_25] : memref<1168x128xf32, #tpu.memory_space<vmem>>, vector<1x128xf32>
    %cst_26 = arith.constant dense<0.000000e+00> : vector<8x128xf32>
    %55 = tpu.matmul %52, %53, %cst_26 {dimension_numbers = #tpu.dot_dimension_numbers<[1], [0], [0], [1], [0, 0, 1, 1], [], []>} : vector<8x128xf32>, vector<128x128xf32>, vector<8x128xf32> -> vector<8x128xf32>
    %56 = vector.broadcast %54 : vector<1x128xf32> to vector<8x128xf32>
    %57 = arith.addf %55, %56 : vector<8x128xf32>
    %58 = math.tanh %57 : vector<8x128xf32>
    %c1024 = arith.constant 1024 : index
    %c0_27 = arith.constant 0 : index
    %59 = vector.load %arg2[%c1024, %c0_27] : memref<1168x128xf32, #tpu.memory_space<vmem>>, vector<128x128xf32>
    %c1160 = arith.constant 1160 : index
    %c0_28 = arith.constant 0 : index
    %60 = vector.load %arg2[%c1160, %c0_28] : memref<1168x128xf32, #tpu.memory_space<vmem>>, vector<1x128xf32>
    %cst_29 = arith.constant dense<0.000000e+00> : vector<8x128xf32>
    %61 = tpu.matmul %58, %59, %cst_29 {dimension_numbers = #tpu.dot_dimension_numbers<[1], [0], [0], [1], [0, 0, 1, 1], [], []>} : vector<8x128xf32>, vector<128x128xf32>, vector<8x128xf32> -> vector<8x128xf32>
    %62 = vector.broadcast %60 : vector<1x128xf32> to vector<8x128xf32>
    %63 = arith.addf %61, %62 : vector<8x128xf32>
    %c0_30 = arith.constant 0 : index
    %c0_31 = arith.constant 0 : index
    %64 = vector.load %arg3[%c0_30, %c0_31] : memref<8x128xf32, #tpu.memory_space<vmem>>, vector<8x128xf32>
    tpu.vector_store %arg3[%c0_30, %c0_31], %63 {strides = array<i32>} : memref<8x128xf32, #tpu.memory_space<vmem>>, vector<8x128xf32>,
    return
  }
}

</mosaic_0001>

<bundles_post_ra>
// kernel: tpu_custom_call.1
= control target key start
LH: loop header
LB: loop body
LE: loop exit
PB: predicated region body
PF: predicated region fallthrough
CT: control target
= control target key end

     0   :  { %8 = vsyncpa [#allocation3], 0  ;;  %s1888_s0 = inlined_call_operand.hbm [shape: f32[8,128], index: 0, kind: input, shape index: {}]   ;;  %s1889_s1 = inlined_call_operand.hbm [shape: f32[8,128], index: 1, kind: input, shape index: {}]   ;;  %s1890_s2 = inlined_call_operand.hbm [shape: f32[1168,128], index: 2, kind: input, shape index: {}]   ;;  %s1891_s3 = inlined_call_operand.hbm [shape: f32[8,128], index: 3, kind: output, shape index: {}]  }
   0x1   :  { %9 = vsyncpa [#allocation6], 0 }
   0x2   :  { %10 = vsyncpa [#allocation4], 0  ;;  %s1720_s12 = smov [#allocation5]   ;;  %s1721_s14 = smov [#allocation2]  }
   0x3   :  { %s27_s13 = sshll.u32 %s1720_s12, 4  ;;  %s17_s15 = sshll.u32 %s1721_s14, 4  ;;  %s28_s13 = int_to_ptr.vmem [resolvable:$true] %s27_s13  ;;  %s18_s15 = int_to_ptr.vmem [resolvable:$true] %s17_s15 }
   0x4   :  { %s1626_s18 = scalar_lea.hbm %s1889_s1, 128 }
   0x5   :  { %p1627_p0 = scmp.ne.s32.totalorder %s1889_s1, %s1626_s18  ;;  %p1630_p1 = scmp.lt.u32.totalorder %s1626_s18, %s1889_s1 }
   0x7   :  { %p1632_p2 = pnand %p1630_p1, %p1627_p0 }
   0x9   :  { %1635 = shalt.err (!%p1632_p2)
}
   0xa   :  { %s1636_s23 = scalar_lea.vmem %s28_s13, 128  ;;  %p1641_p4 = scmp.lt.s32.totalorder %s28_s13, %s28_s13 }
   0xb   :  { %p1637_p3 = scmp.ne.s32.totalorder %s28_s13, %s1636_s23  ;;  %p1642_p5 = scmp.lt.s32.totalorder %s1636_s23, %s1636_s23 }
   0xd   :  { %p1643_p6 = por %p1642_p5, %p1641_p4 }
   0xf   :  { %p1644_p7 = pnand %p1643_p6, %p1637_p3 }
  0x11   :  { %1647 = shalt.err (!%p1644_p7)
}
  0x12   :  { %30 = dma.hbm_to_vmem [thread:$0]  %s1889_s1, 128, %s28_s13, [#allocation6]  }
  0x13   :  { %s1648_s28 = scalar_lea.hbm %s1888_s0, 128 }
  0x14   :  { %p1649_p8 = scmp.ne.s32.totalorder %s1888_s0, %s1648_s28  ;;  %p1652_p9 = scmp.lt.u32.totalorder %s1648_s28, %s1888_s0 }
  0x16   :  { %p1654_p10 = pnand %p1652_p9, %p1649_p8 }
  0x18   :  { %1657 = shalt.err (!%p1654_p10)
}
  0x19   :  { %s1658_s6 = scalar_lea.vmem %s18_s15, 128  ;;  %p1663_p12 = scmp.lt.s32.totalorder %s18_s15, %s18_s15 }
  0x1a   :  { %p1659_p11 = scmp.ne.s32.totalorder %s18_s15, %s1658_s6  ;;  %p1664_p13 = scmp.lt.s32.totalorder %s1658_s6, %s1658_s6 }
  0x1c   :  { %p1665_p0 = por %p1664_p13, %p1663_p12 }
  0x1e   :  { %p1666_p1 = pnand %p1665_p0, %p1659_p11 }
  0x20   :  { %1669 = shalt.err (!%p1666_p1)
}
  0x21   :  { %20 = dma.hbm_to_vmem [thread:$0]  %s1888_s0, 128, %s18_s15, [#allocation3]  }
  0x22   :  { %s1722_s8 = smov [#allocation7]   ;;  %s1670_s12 = scalar_lea.hbm %s1890_s2, 18688 }
  0x23   :  { %s36_s9 = sshll.u32 %s1722_s8, 4  ;;  %p1671_p2 = scmp.ne.s32.totalorder %s1890_s2, %s1670_s12  ;;  %s37_s9 = int_to_ptr.vmem [resolvable:$true] %s36_s9 }
  0x24   :  { %p1674_p3 = scmp.lt.u32.totalorder %s1670_s12, %s1890_s2 }
  0x26   :  { %p1676_p4 = pnand %p1674_p3, %p1671_p2 }
  0x28   :  { %1679 = shalt.err (!%p1676_p4)
}
  0x29   :  { %s1680_s18 = scalar_lea.vmem %s37_s9, 18688  ;;  %p1685_p6 = scmp.lt.s32.totalorder %s37_s9, %s37_s9 }
  0x2a   :  { %p1681_p5 = scmp.ne.s32.totalorder %s37_s9, %s1680_s18  ;;  %p1686_p7 = scmp.lt.s32.totalorder %s1680_s18, %s1680_s18 }
  0x2c   :  { %p1687_p8 = por %p1686_p7, %p1685_p6 }
  0x2e   :  { %p1688_p9 = pnand %p1687_p8, %p1681_p5 }
  0x30   :  { %1691 = shalt.err (!%p1688_p9)
}
  0x31   :  { %s1723_s0 = smov 128   ;;  %s1724_s15 = smov 8  }
  0x32   :  { %42 = dma.hbm_to_vmem [thread:$0]  %s1890_s2, 18688, %s37_s9, [#allocation6], %s1723_s0, %s1723_s0, %s1724_s15  }
  0x33   :  { %1714 = dma.done.wait [#allocation3], 128  }
  0x34   :  { %1715 = vsyncadd [#allocation3], 4294967168 }
  0x35   :  { %1716 = dma.done.wait [#allocation6], 18816  }
  0x36   :  { %1717 = vsyncadd [#allocation6], 4294948480  ;;  %v1725_v0 = vmov 0.0|0.0   ;;  %vm1726_vm0 = vmmov 0   ;;  %v1727_v1 = vmov 0.0   ;;  %v53_v2 = vld [vmem:[#allocation7] sm:$0xff] }
  0x37   :  { %1385 = vmatprep.subr.bf16.mxu0 %v1725_v0  ;;  %1102 = vmatprep.mubr.msk.f32.mxu0 %vm1726_vm0, %v1727_v1  ;;  %v54_v3 = vld [vmem:[#allocation7 + $0x8] sm:$0xff]  ;;  %v55_v4 = vld [vmem:[#allocation7 + $0x10] sm:$0xff]  ;;  %v56_v6 = vld [vmem:[#allocation7 + $0x18] sm:$0xff]  ;;  %s1728_s2 = smov [#allocation8]  }
  0x38   :  { %1409 = vmatprep.subr.bf16.mxu1 %v1725_v0  ;;  %1137 = vmatprep.mubr.msk.f32.mxu1 %vm1726_vm0, %v1727_v1  ;;  %v1386_v5 = vpack.c.bf16 %v54_v3, %v53_v2  ;;  %v1389_v7 = vpack.c.bf16 %v56_v6, %v55_v4  ;;  %v57_v8 = vld [vmem:[#allocation7 + $0x20] sm:$0xff]  ;;  %v58_v9 = vld [vmem:[#allocation7 + $0x28] sm:$0xff]  ;;  %v147_v12 = vld [vmem:[#allocation7 + $0x90] sm:$0xff]  ;;  %s897_s21 = sshll.u32 %s1728_s2, 4  ;;  %s898_s21 = int_to_ptr.vmem [resolvable:$true] %s897_s21 }
  0x39   :  { %v145_v10 = vld [vmem:[#allocation7 + $0x80] sm:$0xff]  ;;  %v146_v11 = vld [vmem:[#allocation7 + $0x88] sm:$0xff]  ;;  %v148_v13 = vld [vmem:[#allocation7 + $0x98] sm:$0xff]  ;;  %v1392_v14 = vpack.c.bf16 %v58_v9, %v57_v8  ;;  %s1692_s22 = scalar_lea.vmem %s898_s21, 128  ;;  %p1697_p11 = scmp.lt.s32.totalorder %s898_s21, %s898_s21 }
  0x3a   :  { %1387 = vmatpush3.bf16.msra.mxu0 %v1386_v5  ;;  %v1410_v15 = vpack.c.bf16 %v146_v11, %v145_v10  ;;  %v59_v16 = vld [vmem:[#allocation7 + $0x30] sm:$0xff]  ;;  %v60_v17 = vld [vmem:[#allocation7 + $0x38] sm:$0xff]  ;;  %v1413_v18 = vpack.c.bf16 %v148_v13, %v147_v12  ;;  %v149_v19 = vld [vmem:[#allocation7 + $0xa0] sm:$0xff]  ;;  %p1693_p10 = scmp.ne.s32.totalorder %s898_s21, %s1692_s22  ;;  %p1698_p12 = scmp.lt.s32.totalorder %s1692_s22, %s1692_s22 }
  0x3b   :  { %1388 = vmatprep.subr.bf16.mxu0 %v1725_v0  ;;  %v150_v20 = vld [vmem:[#allocation7 + $0xa8] sm:$0xff]  ;;  %v1395_v21 = vpack.c.bf16 %v60_v17, %v59_v16  ;;  %v61_v22 = vld [vmem:[#allocation7 + $0x40] sm:$0xff]  ;;  %v151_v25 = vld [vmem:[#allocation7 + $0xb0] sm:$0xff] }
  0x3c   :  { %1411 = vmatpush3.bf16.msra.mxu1 %v1410_v15  ;;  %v62_v23 = vld [vmem:[#allocation7 + $0x48] sm:$0xff]  ;;  %v1416_v24 = vpack.c.bf16 %v150_v20, %v149_v19  ;;  %v152_v26 = vld [vmem:[#allocation7 + $0xb8] sm:$0xff]  ;;  %v63_v28 = vld [vmem:[#allocation7 + $0x50] sm:$0xff]  ;;  %p1699_p13 = por %p1698_p12, %p1697_p11 }
  0x3d   :  { %1412 = vmatprep.subr.bf16.mxu1 %v1725_v0  ;;  %v1398_v27 = vpack.c.bf16 %v62_v23, %v61_v22  ;;  %v64_v29 = vld [vmem:[#allocation7 + $0x58] sm:$0xff]  ;;  %v1419_v30 = vpack.c.bf16 %v152_v26, %v151_v25  ;;  %v153_v31 = vld [vmem:[#allocation7 + $0xc0] sm:$0xff]  ;;  %v154_v32 = vld [vmem:[#allocation7 + $0xc8] sm:$0xff] }
  0x3e   :  { %1390 = vmatpush3.bf16.msra.mxu0 %v1389_v7  ;;  %v1401_v33 = vpack.c.bf16 %v64_v29, %v63_v28  ;;  %v65_v34 = vld [vmem:[#allocation7 + $0x60] sm:$0xff]  ;;  %v66_v35 = vld [vmem:[#allocation7 + $0x68] sm:$0xff]  ;;  %v1422_v36 = vpack.c.bf16 %v154_v32, %v153_v31  ;;  %v67_v38 = vld [vmem:[#allocation7 + $0x70] sm:$0xff]  ;;  %p1700_p0 = pnand %p1699_p13, %p1693_p10 }
  0x3f   :  { %1391 = vmatprep.subr.bf16.mxu0 %v1725_v0  ;;  %v1404_v37 = vpack.c.bf16 %v66_v35, %v65_v34  ;;  %v68_v39 = vld [vmem:[#allocation7 + $0x78] sm:$0xff]  ;;  %v52_v41 = vld [vmem:[#allocation2] sm:$0xff]  ;;  %v157_v45 = vld [vmem:[#allocation7 + $0xe0] sm:$0xff] }
  0x40   :  { %1414 = vmatpush3.bf16.msra.mxu1 %v1413_v18  ;;  %v1407_v40 = vpack.c.bf16 %v68_v39, %v67_v38  ;;  %v155_v42 = vld [vmem:[#allocation7 + $0xd0] sm:$0xff]  ;;  %v156_v43 = vld [vmem:[#allocation7 + $0xd8] sm:$0xff]  ;;  %v158_v46 = vld [vmem:[#allocation7 + $0xe8] sm:$0xff] }
  0x41   :  { %1415 = vmatprep.subr.bf16.mxu1 %v1725_v0  ;;  %v1425_v44 = vpack.c.bf16 %v156_v43, %v155_v42  ;;  %v1428_v47 = vpack.c.bf16 %v158_v46, %v157_v45  ;;  %v159_v48 = vld [vmem:[#allocation7 + $0xf0] sm:$0xff]  ;;  %v160_v49 = vld [vmem:[#allocation7 + $0xf8] sm:$0xff]  ;;  %v237_v51 = vld [vmem:[#allocation7 + $0x100] sm:$0xff] }
  0x42   :  { %1393 = vmatpush3.bf16.msra.mxu0 %v1392_v14  ;;  %v1431_v50 = vpack.c.bf16 %v160_v49, %v159_v48  ;;  %v238_v52 = vld [vmem:[#allocation7 + $0x108] sm:$0xff]  ;;  %v239_v53 = vld [vmem:[#allocation7 + $0x110] sm:$0xff]  ;;  %v240_v55 = vld [vmem:[#allocation7 + $0x118] sm:$0xff] }
  0x43   :  { %1394 = vmatprep.subr.bf16.mxu0 %v1725_v0  ;;  %v1434_v54 = vpack.c.bf16 %v238_v52, %v237_v51  ;;  %v1437_v56 = vpack.c.bf16 %v240_v55, %v239_v53  ;;  %v241_v57 = vld [vmem:[#allocation7 + $0x120] sm:$0xff]  ;;  %v242_v58 = vld [vmem:[#allocation7 + $0x128] sm:$0xff]  ;;  %v243_v60 = vld [vmem:[#allocation7 + $0x130] sm:$0xff] }
  0x44   :  { %1417 = vmatpush3.bf16.msra.mxu1 %v1416_v24  ;;  %v1440_v59 = vpack.c.bf16 %v242_v58, %v241_v57  ;;  %v244_v61 = vld [vmem:[#allocation7 + $0x138] sm:$0xff]  ;;  %v245_v63 = vld [vmem:[#allocation7 + $0x140] sm:$0xff]  ;;  %v246_v2 = vld [vmem:[#allocation7 + $0x148] sm:$0xff] }
  0x45   :  { %1418 = vmatprep.subr.bf16.mxu1 %v1725_v0  ;;  %v1443_v62 = vpack.c.bf16 %v244_v61, %v243_v60  ;;  %v1446_v3 = vpack.c.bf16 %v246_v2, %v245_v63  ;;  %v907_v4 = vld [vmem:[#allocation7 + $0x480] ss:$0 sm:$0xff]  ;;  %v247_v9 = vld [vmem:[#allocation7 + $0x150] sm:$0xff]  ;;  %v248_v10 = vld [vmem:[#allocation7 + $0x158] sm:$0xff] }
  0x46   :  { %1396 = vmatpush3.bf16.msra.mxu0 %v1395_v21  ;;  %v1449_v11 = vpack.c.bf16 %v248_v10, %v247_v9  ;;  %v249_v12 = vld [vmem:[#allocation7 + $0x160] sm:$0xff]  ;;  %v250_v13 = vld [vmem:[#allocation7 + $0x168] sm:$0xff]  ;;  %v251_v15 = vld [vmem:[#allocation7 + $0x170] sm:$0xff] }
  0x47   :  { %1397 = vmatprep.subr.bf16.mxu0 %v1725_v0  ;;  %v1452_v14 = vpack.c.bf16 %v250_v13, %v249_v12  ;;  %v252_v16 = vld [vmem:[#allocation7 + $0x178] sm:$0xff]  ;;  %v329_v18 = vld [vmem:[#allocation7 + $0x180] sm:$0xff]  ;;  %v330_v19 = vld [vmem:[#allocation7 + $0x188] sm:$0xff] }
  0x48   :  { %1420 = vmatpush3.bf16.msra.mxu1 %v1419_v30  ;;  %v1455_v17 = vpack.c.bf16 %v252_v16, %v251_v15  ;;  %v331_v20 = vld [vmem:[#allocation7 + $0x190] sm:$0xff]  ;;  %v1458_v21 = vpack.c.bf16 %v330_v19, %v329_v18  ;;  %v332_v22 = vld [vmem:[#allocation7 + $0x198] sm:$0xff]  ;;  %v333_v24 = vld [vmem:[#allocation7 + $0x1a0] sm:$0xff] }
  0x49   :  { %1421 = vmatprep.subr.bf16.mxu1 %v1725_v0  ;;  %v1461_v23 = vpack.c.bf16 %v332_v22, %v331_v20  ;;  %v334_v25 = vld [vmem:[#allocation7 + $0x1a8] sm:$0xff]  ;;  %v336_v28 = vld [vmem:[#allocation7 + $0x1b8] sm:$0xff]  ;;  %v337_v30 = vld [vmem:[#allocation7 + $0x1c0] sm:$0xff] }
  0x4a   :  { %1399 = vmatpush3.bf16.msra.mxu0 %v1398_v27  ;;  %v1464_v26 = vpack.c.bf16 %v334_v25, %v333_v24  ;;  %v335_v27 = vld [vmem:[#allocation7 + $0x1b0] sm:$0xff]  ;;  %v338_v31 = vld [vmem:[#allocation7 + $0x1c8] sm:$0xff]  ;;  %v340_v39 = vld [vmem:[#allocation7 + $0x1d8] sm:$0xff] }
  0x4b   :  { %1400 = vmatprep.subr.bf16.mxu0 %v1725_v0  ;;  %v1467_v29 = vpack.c.bf16 %v336_v28, %v335_v27  ;;  %v1470_v32 = vpack.c.bf16 %v338_v31, %v337_v30  ;;  %v339_v38 = vld [vmem:[#allocation7 + $0x1d0] sm:$0xff]  ;;  %v342_v42 = vld [vmem:[#allocation7 + $0x1e8] sm:$0xff]  ;;  %v344_v45 = vld [vmem:[#allocation7 + $0x1f8] sm:$0xff] }
  0x4c   :  { %1423 = vmatpush3.bf16.msra.mxu1 %v1422_v36  ;;  %v422_v48 = vld [vmem:[#allocation7 + $0x208] sm:$0xff]  ;;  %v423_v49 = vld [vmem:[#allocation7 + $0x210] sm:$0xff]  ;;  %v424_v51 = vld [vmem:[#allocation7 + $0x218] sm:$0xff] }
  0x4d   :  { %1424 = vmatprep.subr.bf16.mxu1 %v1725_v0  ;;  %v1485_v52 = vpack.c.bf16 %v424_v51, %v423_v49  ;;  %v425_v53 = vld [vmem:[#allocation7 + $0x220] sm:$0xff]  ;;  %v428_v57 = vld [vmem:[#allocation7 + $0x238] sm:$0xff]  ;;  %v430_v60 = vld [vmem:[#allocation7 + $0x248] sm:$0xff] }
  0x4e   :  { %1402 = vmatpush3.bf16.msra.mxu0 %v1401_v33  ;;  %v908_v33 = vld [vmem:[#allocation7 + $0x481] ss:$0 sm:$0xff]  ;;  %v434_v9 = vld [vmem:[#allocation7 + $0x268] sm:$0xff]  ;;  %v436_v12 = vld [vmem:[#allocation7 + $0x278] sm:$0xff] }
  0x4f   :  { %1403 = vmatprep.subr.bf16.mxu0 %v1725_v0  ;;  %v524_v15 = vld [vmem:[#allocation7 + $0x288] sm:$0xff]  ;;  %v525_v16 = vld [vmem:[#allocation7 + $0x290] sm:$0xff]  ;;  %v526_v18 = vld [vmem:[#allocation7 + $0x298] sm:$0xff] }
  0x50   :  { %1426 = vmatpush3.bf16.msra.mxu1 %v1425_v44  ;;  %v343_v44 = vld [vmem:[#allocation7 + $0x1f0] sm:$0xff]  ;;  %v1509_v19 = vpack.c.bf16 %v526_v18, %v525_v16  ;;  %v527_v20 = vld [vmem:[#allocation7 + $0x2a0] sm:$0xff]  ;;  %v630_v16 = vld [vmem:[#allocation7 + $0x378] sm:$0xff] }
  0x51   :  { %1427 = vmatprep.subr.bf16.mxu1 %v1725_v0  ;;  %v1479_v46 = vpack.c.bf16 %v344_v45, %v343_v44  ;;  %v529_v28 = vld [vmem:[#allocation7 + $0x2b0] sm:$0xff]  ;;  %v531_v31 = vld [vmem:[#allocation7 + $0x2c0] sm:$0xff]  ;;  %v616_v44 = vld [vmem:[#allocation7 + $0x308] sm:$0xff] }
  0x52   :  { %1405 = vmatpush3.bf16.msra.mxu0 %v1404_v37  ;;  %v617_v45 = vld [vmem:[#allocation7 + $0x310] sm:$0xff]  ;;  %v619_v49 = vld [vmem:[#allocation7 + $0x320] sm:$0xff] }
  0x53   :  { %1406 = vmatprep.subr.bf16.mxu0 %v1725_v0  ;;  %v707_v18 = vld [vmem:[#allocation7 + $0x380] sm:$0xff] }
  0x54   :  { %1429 = vmatpush3.bf16.msra.mxu1 %v1428_v47  ;;  %v421_v47 = vld [vmem:[#allocation7 + $0x200] sm:$0xff] }
  0x55   :  { %1430 = vmatprep.subr.bf16.mxu1 %v1725_v0 }
  0x56   :  { %1408 = vmatpush3.bf16.msra.mxu0 %v1407_v40  ;;  %v1473_v40 = vpack.c.bf16 %v340_v39, %v339_v38  ;;  %v536_v38 = vld [vmem:[#allocation7 + $0x2e8] sm:$0xff] }
  0x57   :  { %1433 = vmatprep.subr.bf16.mxu0 %v1725_v0 }
  0x58   :  { %1432 = vmatpush3.bf16.msra.mxu1 %v1431_v50  ;;  %v1482_v50 = vpack.c.bf16 %v422_v48, %v421_v47  ;;  %v618_v47 = vld [vmem:[#allocation7 + $0x318] sm:$0xff] }
  0x59   :  { %1103 = vmatmul.mubr.f32.vlgmr.msra.gmra.mrb[0].mxu0 %v52_v41  ;;  %1457 = vmatprep.subr.bf16.mxu1 %v1725_v0  ;;  %v341_v41 = vld [vmem:[#allocation7 + $0x1e0] sm:$0xff]  ;;  %v1533_v48 = vpack.c.bf16 %v618_v47, %v617_v45  ;;  %v722_v45 = vld [vmem:[#allocation7 + $0x3f8] sm:$0xff] }
  0x5a   :  { %1172 = vmatprep.mubr.msk.f32.mxu0 %vm1726_vm0, %v1727_v1  ;;  %1435 = vmatpush3.bf16.msra.mxu0 %v1434_v54  ;;  %v1476_v43 = vpack.c.bf16 %v342_v42, %v341_v41  ;;  %v426_v54 = vld [vmem:[#allocation7 + $0x228] sm:$0xff]  ;;  %v538_v41 = vld [vmem:[#allocation7 + $0x2f8] sm:$0xff]  ;;  %v799_v47 = vld [vmem:[#allocation7 + $0x400] sm:$0xff] }
  0x5b   :  { %1436 = vmatprep.subr.bf16.mxu0 %v1725_v0  ;;  %v1488_v55 = vpack.c.bf16 %v426_v54, %v425_v53  ;;  %v622_v53 = vld [vmem:[#allocation7 + $0x338] sm:$0xff] }
  0x5e   :  { %1438 = vmatpush3.bf16.msra.mxu0 %v1437_v56  ;;  %v427_v56 = vld [vmem:[#allocation7 + $0x230] sm:$0xff] }
  0x5f   :  { %1439 = vmatprep.subr.bf16.mxu0 %v1725_v0  ;;  %v1491_v58 = vpack.c.bf16 %v428_v57, %v427_v56  ;;  %v624_v56 = vld [vmem:[#allocation7 + $0x348] sm:$0xff] }
  0x62   :  { %1441 = vmatpush3.bf16.msra.mxu0 %v1440_v59  ;;  %v429_v59 = vld [vmem:[#allocation7 + $0x240] sm:$0xff] }
  0x63   :  { %1442 = vmatprep.subr.bf16.mxu0 %v1725_v0  ;;  %v1494_v61 = vpack.c.bf16 %v430_v60, %v429_v59 }
  0x66   :  { %1444 = vmatpush3.bf16.msra.mxu0 %v1443_v62  ;;  %v909_v62 = vld [vmem:[#allocation7 + $0x482] ss:$0 sm:$0xff] }
  0x67   :  { %1445 = vmatprep.subr.bf16.mxu0 %v1725_v0 }
  0x6a   :  { %1447 = vmatpush3.bf16.msra.mxu0 %v1446_v3 }
  0x6b   :  { %1448 = vmatprep.subr.bf16.mxu0 %v1725_v0 }
  0x6e   :  { %1450 = vmatpush3.bf16.msra.mxu0 %v1449_v11  ;;  %v435_v11 = vld [vmem:[#allocation7 + $0x270] sm:$0xff] }
  0x6f   :  { %1451 = vmatprep.subr.bf16.mxu0 %v1725_v0  ;;  %v1503_v13 = vpack.c.bf16 %v436_v12, %v435_v11  ;;  %v627_v12 = vld [vmem:[#allocation7 + $0x360] sm:$0xff] }
  0x72   :  { %1453 = vmatpush3.bf16.msra.mxu0 %v1452_v14  ;;  %v523_v14 = vld [vmem:[#allocation7 + $0x280] sm:$0xff] }
  0x73   :  { %1454 = vmatprep.subr.bf16.mxu0 %v1725_v0 }
  0x76   :  { %1456 = vmatpush3.bf16.msra.mxu0 %v1455_v17  ;;  %v1506_v17 = vpack.c.bf16 %v524_v15, %v523_v14  ;;  %v629_v15 = vld [vmem:[#allocation7 + $0x370] sm:$0xff] }
  0x77   :  { %1481 = vmatprep.subr.bf16.mxu0 %v1725_v0 }
 0x12c   :  { %v140_v5 = vpop.f32.mrb[0].mxu0 }
 0x12d   :  { %v141_v6 = vadd.f32 %v907_v4, %v140_v5  ;;  %v1104_v7 = vpop.f32.mrb[1].mxu0  ;;  %v431_v5 = vld [vmem:[#allocation7 + $0x250] sm:$0xff] }
 0x12f   :  { %1610 = vtanh.f32 %v141_v6  ;;  %v432_v6 = vld [vmem:[#allocation7 + $0x258] sm:$0xff] }
 0x130   :  { %v1497_v7 = vpack.c.bf16 %v432_v6, %v431_v5 }
 0x139   :  { %v1611_v8 = vpop.eup %1610 }
 0x13a   :  { %1138 = vmatmul.mubr.f32.vlgmr.msra.gmra.mrb[0].mxu1 %v1611_v8  ;;  %v433_v8 = vld [vmem:[#allocation7 + $0x260] sm:$0xff] }
 0x13b   :  { %1207 = vmatprep.mubr.msk.f32.mxu1 %vm1726_vm0, %v1727_v1  ;;  %1459 = vmatpush3.bf16.msra.mxu1 %v1458_v21  ;;  %v1500_v10 = vpack.c.bf16 %v434_v9, %v433_v8  ;;  %v528_v21 = vld [vmem:[#allocation7 + $0x2a8] sm:$0xff]  ;;  %v625_v9 = vld [vmem:[#allocation7 + $0x350] sm:$0xff] }
 0x13c   :  { %1460 = vmatprep.subr.bf16.mxu1 %v1725_v0  ;;  %v1512_v22 = vpack.c.bf16 %v528_v21, %v527_v20  ;;  %v709_v20 = vld [vmem:[#allocation7 + $0x390] sm:$0xff] }
 0x13f   :  { %1462 = vmatpush3.bf16.msra.mxu1 %v1461_v23  ;;  %v910_v23 = vld [vmem:[#allocation7 + $0x483] ss:$0 sm:$0xff] }
 0x140   :  { %1463 = vmatprep.subr.bf16.mxu1 %v1725_v0 }
 0x143   :  { %1465 = vmatpush3.bf16.msra.mxu1 %v1464_v26 }
 0x144   :  { %1466 = vmatprep.subr.bf16.mxu1 %v1725_v0 }
 0x147   :  { %1468 = vmatpush3.bf16.msra.mxu1 %v1467_v29  ;;  %v530_v29 = vld [vmem:[#allocation7 + $0x2b8] sm:$0xff] }
 0x148   :  { %1469 = vmatprep.subr.bf16.mxu1 %v1725_v0  ;;  %v1515_v30 = vpack.c.bf16 %v530_v29, %v529_v28  ;;  %v714_v28 = vld [vmem:[#allocation7 + $0x3b8] sm:$0xff] }
 0x14b   :  { %1471 = vmatpush3.bf16.msra.mxu1 %v1470_v32  ;;  %v532_v32 = vld [vmem:[#allocation7 + $0x2c8] sm:$0xff] }
 0x14c   :  { %1472 = vmatprep.subr.bf16.mxu1 %v1725_v0 }
 0x14f   :  { %1474 = vmatpush3.bf16.msra.mxu1 %v1473_v40  ;;  %v537_v40 = vld [vmem:[#allocation7 + $0x2f0] sm:$0xff] }
 0x150   :  { %1475 = vmatprep.subr.bf16.mxu1 %v1725_v0  ;;  %v1527_v42 = vpack.c.bf16 %v538_v41, %v537_v40  ;;  %v719_v41 = vld [vmem:[#allocation7 + $0x3e0] sm:$0xff] }
 0x153   :  { %1477 = vmatpush3.bf16.msra.mxu1 %v1476_v43  ;;  %v615_v43 = vld [vmem:[#allocation7 + $0x300] sm:$0xff] }
 0x154   :  { %1478 = vmatprep.subr.bf16.mxu1 %v1725_v0 }
 0x157   :  { %1480 = vmatpush3.bf16.msra.mxu1 %v1479_v46  ;;  %v1530_v46 = vpack.c.bf16 %v616_v44, %v615_v43  ;;  %v721_v44 = vld [vmem:[#allocation7 + $0x3f0] sm:$0xff] }
 0x158   :  { %1505 = vmatprep.subr.bf16.mxu1 %v1725_v0 }
 0x20d   :  { %v232_v34 = vpop.f32.mrb[0].mxu1 }
 0x20e   :  { %v233_v35 = vadd.f32 %v908_v33, %v232_v34  ;;  %v1139_v36 = vpop.f32.mrb[1].mxu1  ;;  %v1518_v33 = vpack.c.bf16 %v532_v32, %v531_v31  ;;  %v533_v34 = vld [vmem:[#allocation7 + $0x2d0] sm:$0xff]  ;;  %v716_v31 = vld [vmem:[#allocation7 + $0x3c8] sm:$0xff] }
 0x210   :  { %1612 = vtanh.f32 %v233_v35  ;;  %v534_v35 = vld [vmem:[#allocation7 + $0x2d8] sm:$0xff] }
 0x211   :  { %v1521_v36 = vpack.c.bf16 %v534_v35, %v533_v34 }
 0x21a   :  { %v1613_v37 = vpop.eup %1612 }
 0x21b   :  { %1173 = vmatmul.mubr.f32.vlgmr.msra.gmra.mrb[2].mxu0 %v1613_v37  ;;  %v535_v37 = vld [vmem:[#allocation7 + $0x2e0] sm:$0xff] }
 0x21c   :  { %1242 = vmatprep.mubr.msk.f32.mxu0 %vm1726_vm0, %v1727_v1  ;;  %1483 = vmatpush3.bf16.msra.mxu0 %v1482_v50  ;;  %v1524_v39 = vpack.c.bf16 %v536_v38, %v535_v37  ;;  %v620_v50 = vld [vmem:[#allocation7 + $0x328] sm:$0xff]  ;;  %v717_v38 = vld [vmem:[#allocation7 + $0x3d0] sm:$0xff] }
 0x21d   :  { %1484 = vmatprep.subr.bf16.mxu0 %v1725_v0  ;;  %v1536_v51 = vpack.c.bf16 %v620_v50, %v619_v49  ;;  %v801_v49 = vld [vmem:[#allocation7 + $0x410] sm:$0xff]  ;;  %v802_v50 = vld [vmem:[#allocation7 + $0x418] sm:$0xff] }
 0x220   :  { %1486 = vmatpush3.bf16.msra.mxu0 %v1485_v52  ;;  %v621_v52 = vld [vmem:[#allocation7 + $0x330] sm:$0xff] }
 0x221   :  { %1487 = vmatprep.subr.bf16.mxu0 %v1725_v0  ;;  %v1539_v54 = vpack.c.bf16 %v622_v53, %v621_v52  ;;  %v803_v52 = vld [vmem:[#allocation7 + $0x420] sm:$0xff]  ;;  %v804_v53 = vld [vmem:[#allocation7 + $0x428] sm:$0xff] }
 0x224   :  { %1489 = vmatpush3.bf16.msra.mxu0 %v1488_v55  ;;  %v623_v55 = vld [vmem:[#allocation7 + $0x340] sm:$0xff] }
 0x225   :  { %1490 = vmatprep.subr.bf16.mxu0 %v1725_v0  ;;  %v1542_v57 = vpack.c.bf16 %v624_v56, %v623_v55  ;;  %v805_v55 = vld [vmem:[#allocation7 + $0x430] sm:$0xff]  ;;  %v806_v56 = vld [vmem:[#allocation7 + $0x438] sm:$0xff] }
 0x228   :  { %1492 = vmatpush3.bf16.msra.mxu0 %v1491_v58  ;;  %v911_v58 = vld [vmem:[#allocation7 + $0x484] ss:$0 sm:$0xff] }
 0x229   :  { %1493 = vmatprep.subr.bf16.mxu0 %v1725_v0 }
 0x22c   :  { %1495 = vmatpush3.bf16.msra.mxu0 %v1494_v61 }
 0x22d   :  { %1496 = vmatprep.subr.bf16.mxu0 %v1725_v0 }
 0x230   :  { %1498 = vmatpush3.bf16.msra.mxu0 %v1497_v7 }
 0x231   :  { %1499 = vmatprep.subr.bf16.mxu0 %v1725_v0 }
 0x234   :  { %1501 = vmatpush3.bf16.msra.mxu0 %v1500_v10  ;;  %v626_v10 = vld [vmem:[#allocation7 + $0x358] sm:$0xff] }
 0x235   :  { %1502 = vmatprep.subr.bf16.mxu0 %v1725_v0  ;;  %v1545_v11 = vpack.c.bf16 %v626_v10, %v625_v9  ;;  %v813_v10 = vld [vmem:[#allocation7 + $0x470] sm:$0xff] }
 0x238   :  { %1504 = vmatpush3.bf16.msra.mxu0 %v1503_v13  ;;  %v628_v13 = vld [vmem:[#allocation7 + $0x368] sm:$0xff] }
 0x239   :  { %1529 = vmatprep.subr.bf16.mxu0 %v1725_v0  ;;  %v1548_v14 = vpack.c.bf16 %v628_v13, %v627_v12  ;;  %v915_v13 = vld [vmem:[#allocation7 + $0x487] ss:$0 sm:$0xff] }
 0x2ee   :  { %v324_v63 = vpop.f32.mrb[2].mxu0 }
 0x2ef   :  { %v325_v2 = vadd.f32 %v909_v62, %v324_v63  ;;  %v1174_v3 = vpop.f32.mrb[3].mxu0  ;;  %v512_v62 = vlaneseq }
 0x2f1   :  { %1614 = vtanh.f32 %v325_v2  ;;  %v513_v2 = vand.u32 127, %v512_v62 }
 0x2f3   :  { %vm514_vm1 = vcmp.lt.s32.totalorder %v513_v2, 3 }
 0x2f4   :  { %v912_v3 = vsel %vm514_vm1, 1.0, %v1727_v1 }
 0x2fb   :  { %v1615_v4 = vpop.eup %1614 }
 0x2fc   :  { %1208 = vmatmul.mubr.f32.vlgmr.msra.gmra.mrb[2].mxu1 %v1615_v4  ;;  %v520_v4 = vld [vmem:[#allocation5] sm:$0xff] }
 0x2fd   :  { %1277 = vmatprep.mubr.msk.f32.mxu1 %vm1726_vm0, %v1727_v1  ;;  %1507 = vmatpush3.bf16.msra.mxu1 %v1506_v17  ;;  %v1551_v17 = vpack.c.bf16 %v630_v16, %v629_v15 }
 0x2fe   :  { %1508 = vmatprep.subr.bf16.mxu1 %v1725_v0 }
 0x301   :  { %1510 = vmatpush3.bf16.msra.mxu1 %v1509_v19  ;;  %v708_v19 = vld [vmem:[#allocation7 + $0x388] sm:$0xff] }
 0x302   :  { %1511 = vmatprep.subr.bf16.mxu1 %v1725_v0  ;;  %v1554_v21 = vpack.c.bf16 %v708_v19, %v707_v18  ;;  %v916_v18 = vld [vmem:[#allocation7 + $0x488] ss:$0 sm:$0xff] }
 0x305   :  { %1513 = vmatpush3.bf16.msra.mxu1 %v1512_v22  ;;  %v710_v22 = vld [vmem:[#allocation7 + $0x398] sm:$0xff] }
 0x306   :  { %1514 = vmatprep.subr.bf16.mxu1 %v1725_v0 }
 0x309   :  { %1516 = vmatpush3.bf16.msra.mxu1 %v1515_v30  ;;  %v715_v30 = vld [vmem:[#allocation7 + $0x3c0] sm:$0xff] }
 0x30a   :  { %1517 = vmatprep.subr.bf16.mxu1 %v1725_v0  ;;  %v1566_v32 = vpack.c.bf16 %v716_v31, %v715_v30 }
 0x30d   :  { %1519 = vmatpush3.bf16.msra.mxu1 %v1518_v33  ;;  %v913_v33 = vld [vmem:[#allocation7 + $0x485] ss:$0 sm:$0xff] }
 0x30e   :  { %1520 = vmatprep.subr.bf16.mxu1 %v1725_v0 }
 0x311   :  { %1522 = vmatpush3.bf16.msra.mxu1 %v1521_v36 }
 0x312   :  { %1523 = vmatprep.subr.bf16.mxu1 %v1725_v0 }
 0x315   :  { %1525 = vmatpush3.bf16.msra.mxu1 %v1524_v39  ;;  %v718_v39 = vld [vmem:[#allocation7 + $0x3d8] sm:$0xff] }
 0x316   :  { %1526 = vmatprep.subr.bf16.mxu1 %v1725_v0  ;;  %v1569_v40 = vpack.c.bf16 %v718_v39, %v717_v38 }
 0x319   :  { %1528 = vmatpush3.bf16.msra.mxu1 %v1527_v42  ;;  %v720_v42 = vld [vmem:[#allocation7 + $0x3e8] sm:$0xff] }
 0x31a   :  { %1553 = vmatprep.subr.bf16.mxu1 %v1725_v0  ;;  %v1572_v43 = vpack.c.bf16 %v720_v42, %v719_v41 }
 0x3cf   :  { %v416_v24 = vpop.f32.mrb[2].mxu1 }
 0x3d0   :  { %v417_v25 = vadd.f32 %v910_v23, %v416_v24  ;;  %v1209_v26 = vpop.f32.mrb[3].mxu1  ;;  %v1557_v23 = vpack.c.bf16 %v710_v22, %v709_v20  ;;  %v711_v24 = vld [vmem:[#allocation7 + $0x3a0] sm:$0xff] }
 0x3d2   :  { %1616 = vtanh.f32 %v417_v25  ;;  %v712_v25 = vld [vmem:[#allocation7 + $0x3a8] sm:$0xff] }
 0x3d3   :  { %v1560_v26 = vpack.c.bf16 %v712_v25, %v711_v24 }
 0x3dc   :  { %v1617_v27 = vpop.eup %1616 }
 0x3dd   :  { %1243 = vmatmul.mubr.f32.vlgmr.msra.gmra.mrb[4].mxu0 %v1617_v27  ;;  %v713_v27 = vld [vmem:[#allocation7 + $0x3b0] sm:$0xff] }
 0x3de   :  { %1312 = vmatprep.mubr.msk.f32.mxu0 %vm1726_vm0, %v1727_v1  ;;  %1531 = vmatpush3.bf16.msra.mxu0 %v1530_v46  ;;  %v1563_v29 = vpack.c.bf16 %v714_v28, %v713_v27  ;;  %v1575_v46 = vpack.c.bf16 %v722_v45, %v721_v44 }
 0x3df   :  { %1532 = vmatprep.subr.bf16.mxu0 %v1725_v0 }
 0x3e2   :  { %1534 = vmatpush3.bf16.msra.mxu0 %v1533_v48  ;;  %v800_v48 = vld [vmem:[#allocation7 + $0x408] sm:$0xff] }
 0x3e3   :  { %1535 = vmatprep.subr.bf16.mxu0 %v1725_v0 }
 0x3e6   :  { %1537 = vmatpush3.bf16.msra.mxu0 %v1536_v51  ;;  %v1581_v51 = vpack.c.bf16 %v802_v50, %v801_v49 }
 0x3e7   :  { %1538 = vmatprep.subr.bf16.mxu0 %v1725_v0 }
 0x3ea   :  { %1540 = vmatpush3.bf16.msra.mxu0 %v1539_v54  ;;  %v1584_v54 = vpack.c.bf16 %v804_v53, %v803_v52 }
 0x3eb   :  { %1541 = vmatprep.subr.bf16.mxu0 %v1725_v0 }
 0x3ee   :  { %1543 = vmatpush3.bf16.msra.mxu0 %v1542_v57  ;;  %v1587_v57 = vpack.c.bf16 %v806_v56, %v805_v55 }
 0x3ef   :  { %1544 = vmatprep.subr.bf16.mxu0 %v1725_v0 }
 0x3f2   :  { %1546 = vmatpush3.bf16.msra.mxu0 %v1545_v11  ;;  %v814_v11 = vld [vmem:[#allocation7 + $0x478] sm:$0xff] }
 0x3f3   :  { %1547 = vmatprep.subr.bf16.mxu0 %v1725_v0  ;;  %v1599_v12 = vpack.c.bf16 %v814_v11, %v813_v10 }
 0x3f6   :  { %1549 = vmatpush3.bf16.msra.mxu0 %v1548_v14 }
 0x3f7   :  { %1550 = vmatprep.subr.bf16.mxu0 %v1725_v0 }
 0x3fa   :  { %1552 = vmatpush3.bf16.msra.mxu0 %v1551_v17 }
 0x3fb   :  { %1577 = vmatprep.subr.bf16.mxu0 %v1725_v0 }
 0x4b0   :  { %v508_v59 = vpop.f32.mrb[4].mxu0 }
 0x4b1   :  { %v509_v60 = vadd.f32 %v911_v58, %v508_v59  ;;  %v1244_v61 = vpop.f32.mrb[5].mxu0  ;;  %v807_v58 = vld [vmem:[#allocation7 + $0x440] sm:$0xff]  ;;  %v808_v59 = vld [vmem:[#allocation7 + $0x448] sm:$0xff] }
 0x4b2   :  { %v914_v61 = vld [vmem:[#allocation7 + $0x486] ss:$0 sm:$0xff] }
 0x4b3   :  { %v518_v63 = vmul.f32 1.442695, %v509_v60  ;;  %v517_v6 = vmul.f32 %v912_v3, %v509_v60  ;;  %v1590_v60 = vpack.c.bf16 %v808_v59, %v807_v58 }
 0x4b5   :  { %1618 = vpow2.f32 %v518_v63 }
 0x4bf   :  { %v1619_v5 = vpop.eup %1618 }
 0x4c0   :  { %v521_v7 = vmul.f32 %v1619_v5, %v520_v4  ;;  %v809_v4 = vld [vmem:[#allocation7 + $0x450] sm:$0xff]  ;;  %v810_v5 = vld [vmem:[#allocation7 + $0x458] sm:$0xff] }
 0x4c2   :  { %v522_v8 = vadd.f32 %v521_v7, %v517_v6  ;;  %v1593_v6 = vpack.c.bf16 %v810_v5, %v809_v4  ;;  %v811_v7 = vld [vmem:[#allocation7 + $0x460] sm:$0xff] }
 0x4c4   :  { %1278 = vmatmul.mubr.f32.vlgmr.msra.gmra.mrb[4].mxu1 %v522_v8  ;;  %v812_v8 = vld [vmem:[#allocation7 + $0x468] sm:$0xff] }
 0x4c5   :  { %1347 = vmatprep.mubr.msk.f32.mxu1 %vm1726_vm0, %v1727_v1  ;;  %1555 = vmatpush3.bf16.msra.mxu1 %v1554_v21  ;;  %v1596_v9 = vpack.c.bf16 %v812_v8, %v811_v7 }
 0x4c6   :  { %1556 = vmatprep.subr.bf16.mxu1 %v1725_v0 }
 0x4c9   :  { %1558 = vmatpush3.bf16.msra.mxu1 %v1557_v23 }
 0x4ca   :  { %1559 = vmatprep.subr.bf16.mxu1 %v1725_v0 }
 0x4cd   :  { %1561 = vmatpush3.bf16.msra.mxu1 %v1560_v26 }
 0x4ce   :  { %1562 = vmatprep.subr.bf16.mxu1 %v1725_v0 }
 0x4d1   :  { %1564 = vmatpush3.bf16.msra.mxu1 %v1563_v29 }
 0x4d2   :  { %1565 = vmatprep.subr.bf16.mxu1 %v1725_v0 }
 0x4d5   :  { %1567 = vmatpush3.bf16.msra.mxu1 %v1566_v32 }
 0x4d6   :  { %1568 = vmatprep.subr.bf16.mxu1 %v1725_v0 }
 0x4d9   :  { %1570 = vmatpush3.bf16.msra.mxu1 %v1569_v40 }
 0x4da   :  { %1571 = vmatprep.subr.bf16.mxu1 %v1725_v0 }
 0x4dd   :  { %1573 = vmatpush3.bf16.msra.mxu1 %v1572_v43 }
 0x4de   :  { %1574 = vmatprep.subr.bf16.mxu1 %v1725_v0 }
 0x4e1   :  { %1576 = vmatpush3.bf16.msra.mxu1 %v1575_v46 }
 0x597   :  { %v610_v34 = vpop.f32.mrb[4].mxu1 }
 0x598   :  { %v611_v35 = vadd.f32 %v913_v33, %v610_v34  ;;  %v1279_v36 = vpop.f32.mrb[5].mxu1 }
 0x59a   :  { %1620 = vtanh.f32 %v611_v35 }
 0x5a4   :  { %v1621_v37 = vpop.eup %1620 }
 0x5a5   :  { %1313 = vmatmul.mubr.f32.vlgmr.msra.gmra.mrb[6].mxu0 %v1621_v37 }
 0x5a6   :  { %1382 = vmatprep.mubr.msk.f32.mxu0 %vm1726_vm0, %v1727_v1  ;;  %v1578_v1 = vpack.c.bf16 %v800_v48, %v799_v47 }
 0x5a8   :  { %1579 = vmatpush3.bf16.msra.mxu0 %v1578_v1 }
 0x5a9   :  { %1580 = vmatprep.subr.bf16.mxu0 %v1725_v0 }
 0x5ac   :  { %1582 = vmatpush3.bf16.msra.mxu0 %v1581_v51 }
 0x5ad   :  { %1583 = vmatprep.subr.bf16.mxu0 %v1725_v0 }
 0x5b0   :  { %1585 = vmatpush3.bf16.msra.mxu0 %v1584_v54 }
 0x5b1   :  { %1586 = vmatprep.subr.bf16.mxu0 %v1725_v0 }
 0x5b4   :  { %1588 = vmatpush3.bf16.msra.mxu0 %v1587_v57 }
 0x5b5   :  { %1589 = vmatprep.subr.bf16.mxu0 %v1725_v0 }
 0x5b8   :  { %1591 = vmatpush3.bf16.msra.mxu0 %v1590_v60 }
 0x5b9   :  { %1592 = vmatprep.subr.bf16.mxu0 %v1725_v0 }
 0x5bc   :  { %1594 = vmatpush3.bf16.msra.mxu0 %v1593_v6 }
 0x5bd   :  { %1595 = vmatprep.subr.bf16.mxu0 %v1725_v0 }
 0x5c0   :  { %1597 = vmatpush3.bf16.msra.mxu0 %v1596_v9 }
 0x5c1   :  { %1598 = vmatprep.subr.bf16.mxu0 %v1725_v0 }
 0x5c4   :  { %1600 = vmatpush3.bf16.msra.mxu0 %v1599_v12 }
 0x678   :  { %v702_v62 = vpop.f32.mrb[6].mxu0 }
 0x679   :  { %v703_v63 = vadd.f32 %v914_v61, %v702_v62  ;;  %v1314_v2 = vpop.f32.mrb[7].mxu0 }
 0x67b   :  { %1622 = vtanh.f32 %v703_v63 }
 0x685   :  { %v1623_v3 = vpop.eup %1622 }
 0x686   :  { %1348 = vmatmul.mubr.f32.vlgmr.msra.gmra.mrb[6].mxu1 %v1623_v3 }
 0x759   :  { %v794_v14 = vpop.f32.mrb[6].mxu1 }
 0x75a   :  { %v795_v15 = vadd.f32 %v915_v13, %v794_v14  ;;  %v1349_v16 = vpop.f32.mrb[7].mxu1 }
 0x75c   :  { %1624 = vtanh.f32 %v795_v15 }
 0x766   :  { %v1625_v17 = vpop.eup %1624 }
 0x767   :  { %1383 = vmatmul.mubr.f32.vlgmr.msra.gmra.mrb[8].mxu0 %v1625_v17 }
 0x83a   :  { %v886_v19 = vpop.f32.mrb[8].mxu0 }
 0x83b   :  { %v887_v20 = vadd.f32 %v916_v18, %v886_v19  ;;  %v1384_v21 = vpop.f32.mrb[9].mxu0 }
 0x83d   :  { %890 = vst [vmem:[#allocation8] sm:$0xff] %v887_v20 }
 0x83e   :  { %1703 = shalt.err (!%p1700_p0)
}
 0x83f   :  { %s1704_s25 = scalar_lea.hbm %s1891_s3, 128 }
 0x840   :  { %p1705_p1 = scmp.ne.s32.totalorder %s1891_s3, %s1704_s25  ;;  %p1708_p2 = scmp.lt.u32.totalorder %s1704_s25, %s1891_s3 }
 0x842   :  { %p1710_p3 = pnand %p1708_p2, %p1705_p1 }
 0x844   :  { %1713 = shalt.err (!%p1710_p3)
}
 0x845   :  { %900 = dma.vmem_to_hbm [thread:$0]  %s898_s21, 128, %s1891_s3, [#allocation4]  }
 0x846   :  { %1718 = dma.done.wait [#allocation4], 128  }
 0x847   :  { %1719 = vsyncadd [#allocation4], 4294967168 }
 0x848   :  { %904 = vsyncpa [#allocation3], 1 }
 0x849   :  { %905 = vsyncpa [#allocation6], 1 }
 0x84a   :  { %906 = vsyncpa [#allocation4], 1 }

</bundles_post_ra>
